<compile_context>
chip_gen: v7x
topology: tpu7x:2x2x1
jax: 0.10.0
libtpu: 0.0.40
codegen_flags: <defaults>
</compile_context>

<pallas_src>
import functools

import jax
import jax.numpy as jnp
from jax import lax
from jax.experimental import pallas as pl
from jax.experimental.pallas import tpu as pltpu

_LANE = 128
_MiB = 1024 * 1024


def _round_up(x, m):
    return ((x + m - 1) // m) * m


def _round_down(x, m):
    return (x // m) * m


def _vmem_budget_bytes():
    """Generation-aware VMEM budget: ~7/8 of physical per-core VMEM, <=112 MiB.

    v5e/v6e (128 MiB physical) -> 112 MiB; v7x (64 MiB physical) -> 56 MiB.
    Leaves headroom for compiler scratch / semaphores rather than requesting
    the entire physical VMEM."""
    try:
        phys = int(pltpu.get_tpu_info().vmem_capacity_bytes)
    except Exception:
        phys = 64 * _MiB  # conservative (v7x per-TensorCore) if the query fails
    return min(phys - phys // 8, 112 * _MiB)


# ---------------------------------------------------------------------------
# Kernels
# ---------------------------------------------------------------------------
def _eca_resident_kernel(feature_ref, mask_ref, w_ref, out_ref):
    """Single-residency path: one whole (1, C, T) sample per grid step."""
    # --- masked mean pooling over time as an MXU matvec (no (C,T) f32 temp) ---
    mask_f32 = mask_ref[0]                                 # (1, T) float32
    feat0 = feature_ref[0]                                 # (C, T) native dtype
    pooled = lax.dot_general(                              # (1, C) f32 accumulate
        mask_f32.astype(feat0.dtype), feat0,
        dimension_numbers=(((1,), (1,)), ((), ())),
        preferred_element_type=jnp.float32)
    tlen = jnp.sum(mask_f32, axis=-1, keepdims=True)       # (1, 1) f32
    # NOTE: unguarded like the PyTorch module — an all-padding sample -> inf/nan.
    pooled = pooled * pl.reciprocal(tlen, approx=False)

    # --- Conv1d(1, 1, 3, padding=1, bias=False) along the channel axis ---
    zcol = jnp.zeros((1, 1), jnp.float32)
    left = jnp.concatenate([zcol, pooled[:, :-1]], axis=1)     # in[c-1]
    right = jnp.concatenate([pooled[:, 1:], zcol], axis=1)     # in[c+1]
    conv = w_ref[0] * left + w_ref[1] * pooled + w_ref[2] * right

    att = jax.nn.sigmoid(conv)                                 # (1, C) f32

    # --- post_scale: rescale so channel attention sums to C ---
    c = att.shape[1]
    inv_sum = pl.reciprocal(jnp.sum(att, axis=1, keepdims=True), approx=False)
    att = att * (jnp.float32(c) * inv_sum)

    # --- apply: re-read feature from VMEM (bounds live ranges; cheap reload) ---
    att_n = att.astype(out_ref.dtype)
    out_ref[...] = (feature_ref[...] * att_n[:, :, None]).astype(out_ref.dtype)


def _eca_pool_kernel(feature_ref, mask_ref, sum_ref, cnt_ref, *, t_total):
    """Streamed phase 1: accumulate masked channel sums / valid counts over T tiles."""
    t = pl.program_id(1)

    @pl.when(t == 0)
    def _():
        sum_ref[...] = jnp.zeros_like(sum_ref)
        cnt_ref[...] = jnp.zeros_like(cnt_ref)

    feat = feature_ref[0]                                  # (C, tt) native dtype
    msk = mask_ref[0]                                      # (1, tt) float32
    tt = feat.shape[-1]
    # Zero the out-of-bounds tail of the (possibly partial) last tile — OOB
    # reads of boundary blocks are garbage and must not reach the MXU products.
    col = lax.broadcasted_iota(jnp.int32, (1, tt), 1) + t * tt
    valid = col < t_total
    msk = jnp.where(valid, msk, 0.0)
    feat = jnp.where(valid, feat, jnp.zeros_like(feat))

    partial = lax.dot_general(                              # (1, C) f32
        msk.astype(feat.dtype), feat,
        dimension_numbers=(((1,), (1,)), ((), ())),
        preferred_element_type=jnp.float32)
    sum_ref[...] += partial[None]                           # (1, 1, C)
    cnt_ref[...] += jnp.sum(msk, axis=-1, keepdims=True)[None]  # (1, 1, 1)


def _eca_apply_kernel(feature_ref, att_ref, out_ref):
    """Streamed phase 2: out = feature * att (att is (1, C, 1), broadcast over T)."""
    out_ref[...] = (feature_ref[...] * att_ref[...]).astype(out_ref.dtype)


# ---------------------------------------------------------------------------
# Wrappers
# ---------------------------------------------------------------------------
def _eca_resident(feature, mask3, w, vmem_limit, donate_feature):
    N, C, T = feature.shape
    return pl.pallas_call(
        _eca_resident_kernel,
        out_shape=jax.ShapeDtypeStruct((N, C, T), feature.dtype),
        grid=(N,),
        in_specs=[
            pl.BlockSpec((1, C, T), lambda n: (n, 0, 0)),       # feature
            pl.BlockSpec((1, 1, T), lambda n: (n, 0, 0)),       # mask
            pl.BlockSpec(memory_space=pltpu.MemorySpace.SMEM),  # conv taps
        ],
        out_specs=pl.BlockSpec((1, C, T), lambda n: (n, 0, 0)),
        compiler_params=pltpu.CompilerParams(
            dimension_semantics=("parallel",),
            vmem_limit_bytes=int(vmem_limit),
        ),
        input_output_aliases=({0: 0} if donate_feature else {}),
    )(feature, mask3, w)


def _eca_streamed(feature, mask3, w, vmem_limit, donate_feature, stream_tile):
    N, C, T = feature.shape
    isz = feature.dtype.itemsize
    if stream_tile is None:
        tt = _round_down(max(vmem_limit // (5 * C * isz), _LANE), _LANE)
    else:
        tt = _round_up(int(stream_tile), _LANE)
    tt = max(_LANE, min(tt, _round_up(T, _LANE)))
    nt = pl.cdiv(T, tt)

    # Phase 1: masked pooled sums + valid counts (reduction axis last, resident
    # output block used as the accumulator).
    sums, counts = pl.pallas_call(
        functools.partial(_eca_pool_kernel, t_total=T),
        out_shape=(jax.ShapeDtypeStruct((N, 1, C), jnp.float32),
                   jax.ShapeDtypeStruct((N, 1, 1), jnp.float32)),
        grid=(N, nt),
        in_specs=[
            pl.BlockSpec((1, C, tt), lambda n, t: (n, 0, t)),
            pl.BlockSpec((1, 1, tt), lambda n, t: (n, 0, t)),
        ],
        out_specs=(pl.BlockSpec((1, 1, C), lambda n, t: (n, 0, 0)),
                   pl.BlockSpec((1, 1, 1), lambda n, t: (n, 0, 0))),
        compiler_params=pltpu.CompilerParams(
            dimension_semantics=("parallel", "arbitrary"),
            vmem_limit_bytes=int(vmem_limit),
        ),
    )(feature, mask3)

    # Tiny (N, C) attention math in plain JAX (O(N*C): negligible vs HBM traffic).
    pooled = sums[:, 0, :] / counts[:, 0, :]                    # (N, C) f32
    pad = jnp.pad(pooled, ((0, 0), (1, 1)))
    conv = w[0] * pad[:, :-2] + w[1] * pad[:, 1:-1] + w[2] * pad[:, 2:]
    att = jax.nn.sigmoid(conv)
    att = att * (jnp.float32(C) / att.sum(axis=1, keepdims=True))
    att = att.astype(feature.dtype)[:, :, None]                 # (N, C, 1)

    # Phase 2: apply.  Both axes "parallel" so v7x's two TensorCores both get
    # work even for a single-sample batch.
    return pl.pallas_call(
        _eca_apply_kernel,
        out_shape=jax.ShapeDtypeStruct((N, C, T), feature.dtype),
        grid=(N, nt),
        in_specs=[
            pl.BlockSpec((1, C, tt), lambda n, t: (n, 0, t)),   # feature
            pl.BlockSpec((1, C, 1), lambda n, t: (n, 0, 0)),    # attention
        ],
        out_specs=pl.BlockSpec((1, C, tt), lambda n, t: (n, 0, t)),
        compiler_params=pltpu.CompilerParams(
            dimension_semantics=("parallel", "parallel"),
            vmem_limit_bytes=int(vmem_limit),
        ),
        input_output_aliases=({0: 0} if donate_feature else {}),
    )(feature, att)


def efficient_channel_attention(feature, mask, conv_weight, *,
                                donate_feature=False,
                                force_streamed=False,
                                stream_tile=None):
    """feature: (N, C, T); mask: (N, T) with 1.0 = valid; conv_weight: (1, 1, 3).

    Equivalent to EfficientChannelAttention.forward (spatial_channels=1,
    kernel_size=3, post_scale=True, mask provided).  Set donate_feature=True
    (and donate the buffer at the jit boundary) when the un-attended feature is
    not needed afterwards: the output then aliases the input HBM buffer.
    """
    N, C, T = feature.shape
    w = conv_weight.reshape(-1).astype(jnp.float32)             # (3,) conv taps
    mask3 = mask.astype(jnp.float32).reshape(N, 1, T)

    budget = _vmem_budget_bytes()
    isz = feature.dtype.itemsize
    # Double-buffered feature-in + out blocks (+ small mask blocks) for the
    # single-residency path.
    resident_bytes = 4 * C * T * isz + 4 * T * 4
    if force_streamed or resident_bytes > budget:
        # Streamed two-phase fallback: +50% HBM traffic (feature read twice)
        # but no per-sample (C, T) VMEM residency requirement — needed on
        # v7x's 64 MiB VMEM for large C*T samples.
        return _eca_streamed(feature, mask3, w, budget, donate_feature, stream_tile)
    return _eca_resident(feature, mask3, w, budget, donate_feature)


def eca_reference(feature, mask, conv_weight):
    """Pure-JAX reference mirroring the PyTorch forward (spatial_channels=1)."""
    m = mask.astype(jnp.float32)
    tlen = m.sum(-1)                                            # (N,)
    att = (feature.astype(jnp.float32) * m[:, None, :]).sum(-1) / tlen[:, None]
    w = conv_weight.reshape(-1).astype(jnp.float32)
    pad = jnp.pad(att, ((0, 0), (1, 1)))
    conv = w[0] * pad[:, :-2] + w[1] * pad[:, 1:-1] + w[2] * pad[:, 2:]
    att = jax.nn.sigmoid(conv)
    C = feature.shape[1]
    att = att * (C / att.sum(1, keepdims=True))
    return (feature.astype(jnp.float32) * att[:, :, None]).astype(feature.dtype)


if __name__ == "__main__":
    key = jax.random.PRNGKey(0)
    k1, k2, k3, k4, k5 = jax.random.split(key, 5)

    # Deterministic Conv1d(1, 1, 3, bias=False) weight, shape (1, 1, 3).
    conv_weight = jax.random.uniform(
        k5, (1, 1, 3), dtype=jnp.float32, minval=-0.5, maxval=0.5)

    def check(out, ref, name, rtol=1e-5, atol=1e-5):
        ok = jnp.allclose(out.astype(jnp.float32), ref.astype(jnp.float32),
                          rtol=rtol, atol=atol)
        if not ok:
            raise AssertionError(f"{name}: Pallas kernel output does not match reference")

    # Case 1: resident path, lane-unaligned T (no pad/slice round-trip anymore).
    N, C, T = 2, 4, 16
    feature = jax.random.normal(k1, (N, C, T), dtype=jnp.float32)
    lengths = jnp.array([16, 10], dtype=jnp.int32)
    mask = (jnp.arange(T)[None, :] < lengths[:, None]).astype(jnp.float32)
    out = jax.block_until_ready(efficient_channel_attention(feature, mask, conv_weight))
    check(out, eca_reference(feature, mask, conv_weight), "case1")

    # Case 2: resident path, lane-aligned T (production-shaped, lane-dense vst).
    N2, C2, T2 = 2, 8, 128
    feature2 = jax.random.normal(k2, (N2, C2, T2), dtype=jnp.float32)
    lengths2 = jnp.array([128, 77], dtype=jnp.int32)
    mask2 = (jnp.arange(T2)[None, :] < lengths2[:, None]).astype(jnp.float32)
    out2 = jax.block_until_ready(efficient_channel_attention(feature2, mask2, conv_weight))
    ref2 = eca_reference(feature2, mask2, conv_weight)
    check(out2, ref2, "case2")

    # Case 3: forced streamed two-phase path (pool + apply), partial tail tile.
    N3, C3, T3 = 2, 8, 200
    feature3 = jax.random.normal(k3, (N3, C3, T3), dtype=jnp.float32)
    lengths3 = jnp.array([200, 131], dtype=jnp.int32)
    mask3_ = (jnp.arange(T3)[None, :] < lengths3[:, None]).astype(jnp.float32)
    out3 = jax.block_until_ready(
        efficient_channel_attention(feature3, mask3_, conv_weight,
                                    force_streamed=True, stream_tile=128))
    check(out3, eca_reference(feature3, mask3_, conv_weight), "case3")

    # Case 4: bf16 features on the resident path (native dtype end-to-end).
    feature4 = jax.random.normal(k4, (N2, C2, T2), dtype=jnp.float32).astype(jnp.bfloat16)
    out4 = jax.block_until_ready(efficient_channel_attention(feature4, mask2, conv_weight))
    ref4 = eca_reference(feature4, mask2, conv_weight)
    check(out4, ref4, "case4", rtol=2e-2, atol=2e-2)

    # Case 5: donated feature buffer (input_output_aliases) under jit donation.
    ref5 = eca_reference(feature2, mask2, conv_weight)
    donated = feature2 + 0.0
    f_don = jax.jit(
        lambda f, m: efficient_channel_attention(f, m, conv_weight, donate_feature=True),
        donate_argnums=(0,))
    out5 = jax.block_until_ready(f_don(donated, mask2))
    check(out5, ref5, "case5")

    print("KERNEL_OK")
</pallas_src>

<mosaic_0001>
module attributes {stable_mosaic.version = 11 : i64} {
  func.func @_eca_resident_kernel(%arg0: i32, %arg1: memref<1x4x16xf32, #tpu.memory_space<vmem>>, %arg2: memref<1x1x16xf32, #tpu.memory_space<vmem>>, %arg3: memref<3xf32, #tpu.memory_space<smem>>, %arg4: memref<1x4x16xf32, #tpu.memory_space<vmem>>) attributes {dimension_semantics = [#tpu.dimension_semantics<parallel>], iteration_bounds = array<i64: 2>, scalar_prefetch = 0 : i64, scratch_operands = 0 : i64, tpu.core_type = #tpu.core_type<tc>, window_params = [{transform_indices = @transform_0, window_bounds = array<i64: 1, 4, 16>}, {transform_indices = @transform_1, window_bounds = array<i64: 1, 1, 16>}, {transform_indices = @transform_2, window_bounds = array<i64: 3>}, {transform_indices = @transform_3, window_bounds = array<i64: 1, 4, 16>}]} {
    %c0 = arith.constant 0 : index
    %c0_0 = arith.constant 0 : index
    %c0_1 = arith.constant 0 : index
    %0 = vector.load %arg2[%c0, %c0_0, %c0_1] : memref<1x1x16xf32, #tpu.memory_space<vmem>>, vector<1x1x16xf32>
    %1 = vector.shape_cast %0 : vector<1x1x16xf32> to vector<1x16xf32>
    %c0_2 = arith.constant 0 : index
    %c0_3 = arith.constant 0 : index
    %c0_4 = arith.constant 0 : index
    %2 = vector.load %arg1[%c0_2, %c0_3, %c0_4] : memref<1x4x16xf32, #tpu.memory_space<vmem>>, vector<1x4x16xf32>
    %3 = vector.shape_cast %2 : vector<1x4x16xf32> to vector<4x16xf32>
    %cst = arith.constant dense<0.000000e+00> : vector<1x4xf32>
    %4 = tpu.matmul %1, %3, %cst {dimension_numbers = #tpu.dot_dimension_numbers<[1], [1], [0], [0], [0, 0, 1, 0], [], []>} : vector<1x16xf32>, vector<4x16xf32>, vector<1x4xf32> -> vector<1x4xf32>
    %cst_5 = arith.constant dense<0.000000e+00> : vector<1xf32>
    %5 = vector.multi_reduction <add>, %1, %cst_5 [1] : vector<1x16xf32> to vector<1xf32>
    %6 = vector.shape_cast %5 : vector<1xf32> to vector<1x1xf32>
    %7 = tpu.reciprocal %6 : vector<1x1xf32> -> vector<1x1xf32>
    %8 = vector.broadcast %7 : vector<1x1xf32> to vector<1x4xf32>
    %9 = arith.mulf %4, %8 : vector<1x4xf32>
    %cst_6 = arith.constant 0.000000e+00 : f32
    %10 = vector.broadcast %cst_6 : f32 to vector<1x1xf32>
    %11 = vector.extract_strided_slice %9 {offsets = [0, 0], sizes = [1, 3], strides = [1, 1]} : vector<1x4xf32> to vector<1x3xf32>
    %12 = tpu.concatenate %10, %11 in 1 : vector<1x1xf32>, vector<1x3xf32> -> vector<1x4xf32>
    %13 = vector.extract_strided_slice %9 {offsets = [0, 1], sizes = [1, 3], strides = [1, 1]} : vector<1x4xf32> to vector<1x3xf32>
    %14 = tpu.concatenate %13, %10 in 1 : vector<1x3xf32>, vector<1x1xf32> -> vector<1x4xf32>
    %c0_7 = arith.constant 0 : index
    %15 = memref.load %arg3[%c0_7] : memref<3xf32, #tpu.memory_space<smem>>
    %16 = vector.broadcast %15 : f32 to vector<1x4xf32>
    %17 = arith.mulf %16, %12 : vector<1x4xf32>
    %c1 = arith.constant 1 : index
    %18 = memref.load %arg3[%c1] : memref<3xf32, #tpu.memory_space<smem>>
    %19 = vector.broadcast %18 : f32 to vector<1x4xf32>
    %20 = arith.mulf %19, %9 : vector<1x4xf32>
    %21 = arith.addf %17, %20 : vector<1x4xf32>
    %c2 = arith.constant 2 : index
    %22 = memref.load %arg3[%c2] : memref<3xf32, #tpu.memory_space<smem>>
    %23 = vector.broadcast %22 : f32 to vector<1x4xf32>
    %24 = arith.mulf %23, %14 : vector<1x4xf32>
    %25 = arith.addf %21, %24 : vector<1x4xf32>
    %26 = arith.negf %25 : vector<1x4xf32>
    %27 = math.exp %26 : vector<1x4xf32>
    %cst_8 = arith.constant 1.000000e+00 : f32
    %28 = vector.broadcast %cst_8 : f32 to vector<1x4xf32>
    %29 = arith.addf %28, %27 : vector<1x4xf32>
    %30 = arith.divf %28, %29 : vector<1x4xf32>
    %cst_9 = arith.constant dense<0.000000e+00> : vector<1xf32>
    %31 = vector.multi_reduction <add>, %30, %cst_9 [1] : vector<1x4xf32> to vector<1xf32>
    %32 = vector.shape_cast %31 : vector<1xf32> to vector<1x1xf32>
    %33 = tpu.reciprocal %32 : vector<1x1xf32> -> vector<1x1xf32>
    %cst_10 = arith.constant 4.000000e+00 : f32
    %34 = vector.broadcast %cst_10 : f32 to vector<1x1xf32>
    %35 = arith.mulf %34, %33 : vector<1x1xf32>
    %36 = vector.broadcast %35 : vector<1x1xf32> to vector<1x4xf32>
    %37 = arith.mulf %30, %36 : vector<1x4xf32>
    %c0_11 = arith.constant 0 : index
    %c0_12 = arith.constant 0 : index
    %c0_13 = arith.constant 0 : index
    %38 = vector.load %arg1[%c0_11, %c0_12, %c0_13] : memref<1x4x16xf32, #tpu.memory_space<vmem>>, vector<1x4x16xf32>
    %39 = vector.shape_cast %37 : vector<1x4xf32> to vector<1x4x1xf32>
    %40 = vector.broadcast %39 : vector<1x4x1xf32> to vector<1x4x16xf32>
    %41 = arith.mulf %38, %40 : vector<1x4x16xf32>
    %c0_14 = arith.constant 0 : index
    %c0_15 = arith.constant 0 : index
    %c0_16 = arith.constant 0 : index
    %42 = vector.load %arg4[%c0_14, %c0_15, %c0_16] : memref<1x4x16xf32, #tpu.memory_space<vmem>>, vector<1x4x16xf32>
    tpu.vector_store %arg4[%c0_14, %c0_15, %c0_16], %41 {strides = array<i32>} : memref<1x4x16xf32, #tpu.memory_space<vmem>>, vector<1x4x16xf32>,
    return
  }
  func.func @transform_0(%arg0: i32) -> (i32, i32, i32) {
    %c0_i32 = arith.constant 0 : i32
    %c0_i32_0 = arith.constant 0 : i32
    %c0_i32_1 = arith.constant 0 : i32
    return %arg0, %c0_i32, %c0_i32_0 : i32, i32, i32
  }
  func.func @transform_1(%arg0: i32) -> (i32, i32, i32) {
    %c0_i32 = arith.constant 0 : i32
    %c0_i32_0 = arith.constant 0 : i32
    %c0_i32_1 = arith.constant 0 : i32
    return %arg0, %c0_i32, %c0_i32_0 : i32, i32, i32
  }
  func.func @transform_2(%arg0: i32) -> i32 {
    %c0_i32 = arith.constant 0 : i32
    %c0_i32_0 = arith.constant 0 : i32
    return %c0_i32 : i32
  }
  func.func @transform_3(%arg0: i32) -> (i32, i32, i32) {
    %c0_i32 = arith.constant 0 : i32
    %c0_i32_0 = arith.constant 0 : i32
    %c0_i32_1 = arith.constant 0 : i32
    return %arg0, %c0_i32, %c0_i32_0 : i32, i32, i32
  }
}

</mosaic_0001>

<bundles_post_ra>
// kernel: tpu_custom_call.1
= control target key start
LH: loop header
LB: loop body
LE: loop exit
PB: predicated region body
PF: predicated region fallthrough
CT: control target
= control target key end

     0   :  { %8 = vsyncpa [#allocation3], 0  ;;  %s893_s0 = inlined_call_operand.hbm [shape: f32[2,4,16], index: 0, kind: input, shape index: {}]   ;;  %s894_s1 = inlined_call_operand.vmem [shape: f32[2,1,16], index: 1, kind: input, shape index: {}]   ;;  %s895_s2 = inlined_call_operand.vmem [shape: f32[3], index: 2, kind: input, shape index: {}]   ;;  %s896_s3 = inlined_call_operand.hbm [shape: f32[2,4,16], index: 3, kind: output, shape index: {}]  }
   0x1   :  { %10 = vsyncpa [#allocation3 + $0x1], 0 }
   0x2   :  { %11 = vsyncpa [#allocation5], 0 }
   0x3   :  { %12 = vsyncpa [#allocation4], 0 }
   0x4   :  { %14 = vsyncpa [#allocation4 + $0x1], 0  ;;  %s688_s12 = smov 0   ;;  %s690_s13 = smov 0  }
   0x5   :  { %s692_s14 = smov 0   ;;  %s694_s15 = smov 0  }
   0x6 LB: > { %s709_s16 = sadd.s32 4294967295, %s659_s15   ;;  %s449_s17 = sadd.s32 4294967294, %s659_s15   ;;  %s659_s15 = sphi %s694_s15, %s917_s15   ;;  %s655_s14 = sphi %s692_s14, %s916_s14   ;;  %s651_s13 = sphi %s690_s13, %s915_s13   ;;  %s647_s12 = sphi %s688_s12, %s914_s12  }
   0x7   : > { %p40_p0 = scmp.ne.s32.totalorder %s651_s13, %s647_s12  ;;  %p897_p1 = scmp.eq.s32.totalorder %s709_s16, 0 }
   0x8   : > { %p117_p3 = scmp.eq.s32.totalorder %s449_s17, 1  ;;  %p450_p5 = scmp.ge.s32.totalorder %s659_s15, 1 }
   0x9   : > { %p718_p4 = por %p897_p1, %p40_p0  ;;  %p124_p7 = scmp.lt.s32.totalorder %s659_s15, 3 }
   0xa   : > { %p723_p6 = por %p117_p3, %p40_p0  ;;  %s137_s22 = sshll.u32 %s895_s2, 4  ;;  %s138_s22 = int_to_ptr.vmem [resolvable:$true] %s137_s22 }
   0xb   : > { %s900_s18 = scalar_select %p718_p4, 1, 0 }
   0xc   : > { %s901_s19 = scalar_select %p723_p6, 1, 0 }
   0xd   : > { %p731_p8 = pnand %p450_p5, %p124_p7  ;;  %s739_s24 = sadd.s32 1, %s659_s15  }
   0xe   : > { %s24_s26 = ssub.s32 %s659_s15, %s739_s24  ;;  %s27_s28 = sadd.s32 1, %s655_s14 }
   0xf   : > { %p483_p10 = pneg %p731_p8  ;;  %p749_p12 = scmp.eq.s32.totalorder %s24_s26, 0 }
  0x10   : > { %p34_p13 = scmp.ne.s32.totalorder %s655_s14, %s651_s13  ;;  %s544_s29 = scalar_lea.vmem %s138_s22, 16 }
  0x11   : > { %p743_p11 = pnand %p483_p10, %p897_p1  ;;  %p545_p0 = scmp.ne.s32.totalorder %s138_s22, %s544_s29 }
  0x12   : > { %p552_p9 = scmp.lt.s32.totalorder %s138_s22, %s138_s22  ;;  %p553_p2 = scmp.lt.s32.totalorder %s544_s29, %s544_s29 }
  0x13   : > { %p546_p3 = pneg %p743_p11 }
  0x14   : > { %p554_p10 = por %p553_p2, %p552_p9 }
  0x15   : > { %p547_p5 = pnand %p546_p3, %p545_p0 }
  0x17   : > { %p548_p7 = pneg %p547_p5 }
  0x19   : > { %p555_p1 = pnand %p554_p10, %p548_p7 }
  0x1b   : > { %558 = shalt.err (!%p555_p1)
}
  0x1c   : > { %s661_s30 = smov [#allocation6]   ;;  %p35_p2 = scmp.eq.s32.totalorder %s659_s15, 0 }
  0x1d   : > { %486 = dma.vmem_to_smem (!%p743_p11), %s138_s22, 16, %s661_s30, [#allocation5]  }
  0x1e   : > { %s763_s4 = scalar_select %p749_p12, %s655_s14, %s27_s28  }
  0x1f   : > { %p905_p1 = scmp.eq.s32.totalorder %s709_s16, 1  ;;  %p496_p0 = scmp.lt.s32.totalorder %s659_s15, 2 }
  0x20   : > { %s148_s6 = sand.u32 1, %s655_s14   ;;  %p36_p3 = por %p35_p2, %p34_p13 }
  0x21   : > { %p771_p9 = por %p905_p1, %p34_p13  ;;  %s453_s7 = sshll.u32 %s148_s6, 2 }
  0x22   : > { %s454_s8 = sshll.u32 %s659_s15, 6  ;;  %s152_s17 = scalar_lea.vmem [#allocation2], %s453_s7 }
  0x23   : > { %s906_s5 = scalar_select %p771_p9, 1, 0 }
  0x24   : > { %s784_s11 = scalar_lea.hbm %s893_s0, %s454_s8  ;;  %s159_s20 = sshll.u32 %s152_s17, 4  ;;  %s790_s20 = int_to_ptr.vmem [resolvable:$true] %s159_s20 }
  0x25   : > { %p786_p11 = pnand %p496_p0, %p36_p3  ;;  %s149_s22 = scalar_lea.sflag [#allocation3], %s148_s6 }
  0x26   : > { %s559_s25 = scalar_lea.hbm %s784_s11, 64  ;;  %s564_s28 = scalar_lea.hbm %s893_s0, 128 }
  0x27   : > { %p560_p12 = scmp.ne.s32.totalorder %s784_s11, %s559_s25  ;;  %p561_p13 = pneg %p786_p11 }
  0x28   : > { %p565_p10 = scmp.lt.u32.totalorder %s784_s11, %s893_s0  ;;  %p566_p2 = scmp.lt.u32.totalorder %s564_s28, %s559_s25 }
  0x29   : > { %p562_p5 = pnand %p561_p13, %p560_p12  ;;  %p568_p0 = scmp.lt.u32.totalorder %s559_s25, %s784_s11 }
  0x2a   : > { %p567_p1 = por %p566_p2, %p565_p10 }
  0x2b   : > { %p563_p7 = pneg %p562_p5 }
  0x2c   : > { %p569_p3 = por %p568_p0, %p567_p1 }
  0x2e   : > { %p570_p6 = pnand %p569_p3, %p563_p7 }
  0x30   : > { %573 = shalt.err (!%p570_p6)
}
  0x31   : > { %s574_s6 = scalar_lea.vmem %s790_s20, 64  ;;  %s662_s7 = smov [#allocation2]  }
  0x32   : > { %p575_p12 = scmp.ne.s32.totalorder %s790_s20, %s574_s6  ;;  %s579_s8 = sshll.u32 %s662_s7, 4  ;;  %s580_s8 = int_to_ptr.vmem [resolvable:$false] %s579_s8 }
  0x33   : > { %s581_s9 = scalar_lea.vmem %s580_s8, 128  ;;  %p582_p4 = scmp.lt.s32.totalorder %s790_s20, %s580_s8 }
  0x34   : > { %p577_p5 = pnand %p575_p12, %p561_p13  ;;  %p583_p10 = scmp.lt.s32.totalorder %s581_s9, %s574_s6 }
  0x36   : > { %p578_p9 = pneg %p577_p5  ;;  %p584_p2 = por %p583_p10, %p582_p4 }
  0x38   : > { %p585_p1 = pnand %p584_p2, %p578_p9 }
  0x3a   : > { %588 = shalt.err (!%p585_p1)
}
  0x3b   : > { %490 = dma.hbm_to_vmem [thread:$0]  (!%p786_p11), %s784_s11, 64, %s790_s20, %s149_s22  }
  0x3c   : > { %174 = sbr.rel (%p731_p8) target bundleno = 733 (0x2dd), region = 32  ;;  %s820_s10 = sand.u32 (!%p731_p8), 1, %s651_s13  }
  0x3d   : > { %s456_s17 = sshll.u32 (!%p731_p8), %s820_s10, 2  ;;  %s177_s25 = scalar_lea.sflag (!%p731_p8), [#allocation3], %s820_s10 }
  0x3e   : > { %s180_s26 = scalar_lea.vmem (!%p731_p8), [#allocation2], %s456_s17  ;;  %p908_p4 = scmp.ne.s32.totalorder (!%p731_p8), %s900_s18, 0 }
  0x43   : > { %634 = dma.done.wait (%p908_p4), %s177_s25, 64  }
  0x44   : > { %636 = vsyncadd (%p908_p4), %s177_s25, 4294967232  ;;  %p909_p6 = scmp.eq.s32.totalorder %s709_s16, 0 }
  0x46   : > { %638 = dma.done.wait (%p909_p6), [#allocation5], 16   ;;  %p910_p8 = pmov %p909_p6 }
  0x48   : > { %640 = vsyncadd (%p910_p8), [#allocation5], 4294967280 }
  0x49   : > { %189 = sfence }
  0x4a   : > { %v834_v0 = vld [vmem:[%s180_s26] sm:$0xf]  ;;  %vm216_vm0 = vcmask 130048   ;;  %p211_p9 = scmp.lt.s32.totalorder %s709_s16, 1  ;;  %v663_v1 = vmov 0.0   ;;  %vm664_vm1 = vmmov 0   ;;  %v334_v27 = vlaneseq }
  0x4b   : > { %470 = vmatprep.subr.mxu0 %v663_v1  ;;  %472 = vmatprep.mubr.msk.f32.mxu0 %vm664_vm1, %v663_v1  ;;  %vm293_vm2 = vcmask 122880   ;;  %s665_s21 = smov 127   ;;  %s666_s22 = smov 1   ;;  %vm308_vm3 = vcmask 23552   ;;  %vm303_vm4 = vcmask 7168   ;;  %vm327_vm5 = vcmask 24576  }
  0x4c   : > { %471 = vmatpush3.xpose.msk.msra.mxu0 %vm216_vm0, %v834_v0  ;;  %s212_s18 = scalar_select %p211_p9, %s709_s16, 1  ;;  %v335_v28 = vshrl.u32 %v334_v27, 7  ;;  %vm342_vm6 = vcmask 125952  }
  0x4d   : > { %s461_s27 = sld [smem:[#allocation6 + $0x1]]  ;;  %s310_s28 = sld [smem:[#allocation6]] }
  0x4e   : > { %s213_s20 = scalar_lea.vmem %s894_s1, %s212_s18  ;;  %s462_s29 = sld [smem:[#allocation6 + $0x2]]  ;;  %v336_v31 = vsub.s32 0, %v335_v28 }
  0x4f   : > { %v214_v2 = vld [vmem:[%s213_s20] sm:$0x1]  ;;  %s465_s30 = sshll.u32 %s709_s16, 6  ;;  %s210_s6 = scalar_lea.vmem [#allocation7], %s456_s17 }
  0x50   : > { %473 = vmatmul.mubr.msk.f32.vlgmr.msra.gmra.mrb[0].mxu0 %vm216_vm0, %v214_v2  ;;  %v294_v3 = vsel %vm293_vm2, %v214_v2, 0.0  ;;  %s358_s7 = sshll.u32 %s210_s6, 4  ;;  %s849_s25 = scalar_lea.hbm %s896_s3, %s465_s30  ;;  %s851_s7 = int_to_ptr.vmem [resolvable:$true] %s358_s7 }
  0x51   : > { %295 = vadd.xlane.f32.xlu0 %v294_v3  ;;  %s345_s26 = scalar_lea.sflag [#allocation4], %s820_s10  ;;  %s589_s16 = scalar_lea.vmem %s851_s7, 64 }
  0x52   : > { %p590_p11 = scmp.ne.s32.totalorder %s851_s7, %s589_s16  ;;  %p911_p13 = scmp.ne.s32.totalorder %s906_s5, 0 }
  0x53   : > { %v314_v9 = vstv %s461_s27  ;;  %v311_v10 = vstv %s310_s28  ;;  %s667_s17 = smov [#allocation7]  }
  0x54   : > { %v318_v13 = vstv %s462_s29  ;;  %p591_p7 = pnand %p590_p11, %p911_p13  ;;  %s593_s18 = sshll.u32 %s667_s17, 4  ;;  %s594_s18 = int_to_ptr.vmem [resolvable:$false] %s593_s18 }
  0x55   : > { %s595_s23 = scalar_lea.vmem %s594_s18, 128  ;;  %p596_p3 = scmp.lt.s32.totalorder %s851_s7, %s594_s18 }
  0x56   : > { %p592_p0 = pneg %p591_p7  ;;  %p597_p12 = scmp.lt.s32.totalorder %s595_s23, %s589_s16 }
  0x58   : > { %p598_p5 = por %p597_p12, %p596_p3 }
  0x5a   : > { %p599_p10 = pnand %p598_p5, %p592_p0 }
  0xde   : > { %v296_v4 = vpop.xlane.xlu0 %295 }
  0xdf   : > { %536 = vrcp.f32 %v296_v4 }
  0xe9   : > { %v537_v5 = vpop.eup %536 }
 0x123   : > { %v289_v6 = vpop.f32.mrb[0].mxu0 }
 0x124   : > { %v298_v7 = vmul.f32 %v537_v5, %v289_v6  ;;  %v474_v8 = vpop.f32.mrb[1].mxu0 }
 0x126   : > { %305 = vrot.lane.b32.xlu1 %v298_v7, %s665_s21  ;;  %300 = vrot.lane.b32.xlu0 %v298_v7, %s666_s22  ;;  %v315_v16 = vmul.f32 %v314_v9, %v298_v7 }
 0x198   : > { %v306_v11 = vpop.permute.xlu1 %305  ;;  %v301_v12 = vpop.permute.xlu0 %300 }
 0x199   : > { %v309_v14 = vsel %vm308_vm3, %v306_v11, 0.0  ;;  %v304_v15 = vsel %vm303_vm4, 0.0, %v301_v12 }
 0x19a   : > { %v312_v17 = vmul.f32 %v311_v10, %v304_v15  ;;  %v319_v18 = vmul.f32 %v318_v13, %v309_v14 }
 0x19c   : > { %v316_v19 = vadd.f32 %v315_v16, %v312_v17 }
 0x19e   : > { %v320_v20 = vadd.f32 %v319_v18, %v316_v19 }
 0x1a0   : > { %v463_v21 = vmul.f32 -1.442695, %v320_v20 }
 0x1a2   : > { %538 = vpow2.f32 %v463_v21 }
 0x1ac   : > { %v539_v22 = vpop.eup %538 }
 0x1ad   : > { %v324_v23 = vadd.f32 1.0, %v539_v22 }
 0x1af   : > { %540 = vrcp.f32 %v324_v23 }
 0x1b9   : > { %v541_v24 = vpop.eup %540 }
 0x1ba   : > { %v328_v25 = vsel %vm327_vm5, %v541_v24, 0.0 }
 0x1bb   : > { %329 = vadd.xlane.f32.xlu1 %v328_v25 }
 0x248   : > { %v330_v26 = vpop.xlane.xlu1 %329 }
 0x249   : > { %542 = vrcp.f32 %v330_v26 }
 0x253   : > { %v543_v29 = vpop.eup %542 }
 0x254   : > { %v332_v30 = vmul.f32 4.0, %v543_v29 }
 0x256   : > { %v333_v32 = vmul.f32 %v541_v24, %v332_v30 }
 0x258   : > { %v337_v33 = vrot.slane %v333_v32, %v336_v31 }
 0x25a   : > { %339 = vbcast.lane.b32.xlu0 %v337_v33, 256 }
 0x2cc   : > { %v340_v34 = vpop.permute.xlu0 %339 }
 0x2cd   : > { %v341_v35 = vmul.f32 %v340_v34, %v834_v0 }
 0x2cf   : > { %343 = vst.msk [vmem:[%s210_s6] sm:$0xf] %vm342_vm6, %v341_v35 }
 0x2d0   : > { %602 = shalt.err (!%p599_p10)
}
 0x2d1   : > { %s603_s10 = scalar_lea.hbm %s849_s25, 64  ;;  %s607_s21 = scalar_lea.hbm %s896_s3, 128 }
 0x2d2   : > { %p604_p2 = scmp.ne.s32.totalorder %s849_s25, %s603_s10  ;;  %p608_p6 = scmp.lt.u32.totalorder %s849_s25, %s896_s3 }
 0x2d3   : > { %p609_p8 = scmp.lt.u32.totalorder %s607_s21, %s603_s10  ;;  %p611_p11 = scmp.lt.u32.totalorder %s603_s10, %s849_s25 }
 0x2d4   : > { %p605_p1 = pnand %p604_p2, %p911_p13 }
 0x2d5   : > { %p610_p9 = por %p609_p8, %p608_p6 }
 0x2d6   : > { %p606_p4 = pneg %p605_p1 }
 0x2d7   : > { %p612_p7 = por %p611_p11, %p610_p9 }
 0x2d9   : > { %p613_p0 = pnand %p612_p7, %p606_p4 }
 0x2db   : > { %616 = shalt.err (!%p613_p0)
}
 0x2dc   : > { %481 = dma.vmem_to_hbm [thread:$0]  (%p911_p13), %s851_s7, 64, %s849_s25, %s345_s26  }
 0x2dd PF: > { %s370_s28 = sand.u32 1, %s647_s12   ;;  %p912_p3 = scmp.ne.s32.totalorder %s901_s19, 0 }
 0x2de   : > { %p913_p12 = scmp.ge.s32.totalorder %s659_s15, 2  ;;  %s371_s29 = scalar_lea.sflag [#allocation4], %s370_s28 }
 0x2e0   : > { %p492_p5 = pnand %p913_p12, %p912_p3 }
 0x2e2   : > { %642 = dma.done.wait (!%p492_p5), %s371_s29, 64  }
 0x2e3   : > { %644 = vsyncadd (!%p492_p5), %s371_s29, 4294967232  ;;  %p17_p10 = scmp.ge.s32.totalorder %s739_s24, 4   ;;  %s914_s12 = smov %s651_s13 }
 0x2e4   : > { %s915_s13 = smov %s655_s14  ;;  %s916_s14 = smov %s763_s4 }
 0x2e5   : > { %s917_s15 = smov %s739_s24  ;;  %19 = sbr.rel (!%p17_p10) target bundleno = 6 (0x6), region = 85 }
 0x2ec   :  { %376 = vsyncpa [#allocation3], 1 }
 0x2ed   :  { %378 = vsyncpa [#allocation3 + $0x1], 1 }
 0x2ee   :  { %379 = vsyncpa [#allocation4], 1 }
 0x2ef   :  { %381 = vsyncpa [#allocation4 + $0x1], 1 }
 0x2f0   :  { %382 = vsyncpa [#allocation5], 1 }
 0x2f1   :  { %384 = vsyncpa [#allocation5 + $0x1], 1 }

</bundles_post_ra>
